<compile_context>
chip_gen: v6e
topology: v6e:2x2x1
jax: 0.10.0
libtpu: 0.0.40
codegen_flags: <defaults>
</compile_context>

<pallas_src>
import math

import jax
import jax.numpy as jnp
from jax import lax
from jax.experimental import pallas as pl
from jax.experimental.pallas import tpu as pltpu


def _round_up(x, m):
    return ((x + m - 1) // m) * m


def _make_arcface_kernel(scale, margin, tile_c, use_bf16_matmul):
    cos_m = math.cos(margin)
    sin_m = math.sin(margin)
    threshold = math.cos(math.pi - margin)
    mm = math.sin(math.pi - margin) * margin

    def arcface_kernel(xn_ref, w_ref, inv_wn_ref, lab_ref, out_ref, cos_ref):
        xn = xn_ref[...]          # (tb, D)  already L2-normalized, f32
        w = w_ref[...]            # (tc, D)  un-normalized weight tile (native layout)
        inv_wn = inv_wn_ref[...]  # (1, tc)  precomputed 1/max(||w||, 1e-12)
        lab = lab_ref[...]        # (tb, 1)  int32 labels

        if use_bf16_matmul:
            xn = xn.astype(jnp.bfloat16)
            w = w.astype(jnp.bfloat16)

        # (tb, tc) = xn @ w.T, contracting the last dim of both operands.
        cosine = lax.dot_general(
            xn, w,
            dimension_numbers=(((1,), (1,)), ((), ())),
            preferred_element_type=jnp.float32,
        ) * inv_wn

        # max(., 0) protects against |cosine| > 1 from float error; the upper
        # clamp of the old clip was mathematically dead.
        sine = jnp.sqrt(jnp.maximum(1.0 - cosine * cosine, 0.0))
        phi = cosine * cos_m - sine * sin_m
        phi = jnp.where(cosine > threshold, phi, cosine - mm)

        # one_hot for this class tile: shift the label by the tile origin
        # ((tb,1) work) instead of offsetting a full (tb,tc) iota.
        j = pl.program_id(0)                      # class-tile index (outer axis)
        lab_local = lab - j * tile_c              # (tb, 1)
        col_ids = lax.broadcasted_iota(jnp.int32, cosine.shape, 1)
        one_hot = col_ids == lab_local            # (tb, tc) bool

        cos_s = cosine * scale
        out_ref[...] = jnp.where(one_hot, phi * scale, cos_s).astype(out_ref.dtype)
        cos_ref[...] = cos_s.astype(cos_ref.dtype)

    return arcface_kernel


def _vmem_capacity_bytes():
    try:
        info = pltpu.get_tpu_info()
        cap = int(getattr(info, "vmem_capacity_bytes", 64 * 1024 * 1024))
        if cap > 0:
            return cap
    except Exception:
        pass
    return 64 * 1024 * 1024


def _choose_tiles(B, C, D, tile_b, tile_c, cos_itemsize, budget):
    """Pick (tb, tc) so the double-buffered per-step footprint fits `budget`."""
    def footprint(tb, tc):
        inputs = 2 * 4 * (tb * D + tc * D + tc + tb)      # xn, w, inv_wn, labels
        outputs = 2 * tb * tc * (4 + cos_itemsize)        # logits + cosine
        return inputs + outputs

    tb = B if B <= tile_b else max(8, (tile_b // 8) * 8)
    tc = C if C <= tile_c else max(128, (tile_c // 128) * 128)
    while tc > 128 and footprint(tb, tc) > budget:
        tc = max(128, ((tc // 2) // 128) * 128)
    while tb > 8 and footprint(tb, tc) > budget:
        tb = max(8, ((tb // 2) // 8) * 8)
    return tb, tc, footprint(tb, tc)


def arcface_forward(x, weight, label, scale=30.0, margin=0.5,
                    tile_b=256, tile_c=4096, cos_dtype=jnp.bfloat16,
                    use_bf16_matmul=False):
    """ArcFace forward.  Returns (scaled arcface logits f32, scaled cosine)."""
    B, D = x.shape
    C, D2 = weight.shape
    assert D == D2

    # Normalize x once in the wrapper (tiny B*D work vs B*C*D in the kernel).
    xf = x.astype(jnp.float32)
    x_ss = jnp.sum(xf * xf, axis=-1, keepdims=True)
    xn = xf * lax.rsqrt(jnp.maximum(x_ss, 1e-24))          # == x / max(||x||, 1e-12)

    # Weight stays in native (C, D) layout (no transpose pass over HBM).
    wf = weight.astype(jnp.float32)
    # Per-class inverse norm precomputed once (one C*D pass) instead of per tile.
    w_ss = jnp.sum(wf * wf, axis=-1)                       # (C,)
    inv_wn = lax.rsqrt(jnp.maximum(w_ss, 1e-24)).reshape(1, C)

    lab = label.reshape(B, 1).astype(jnp.int32)

    # Device-VMEM- and D-aware tile sizing (v7x: 64 MiB, v5e/v6e: 128 MiB).
    vmem_cap = _vmem_capacity_bytes()
    budget = int(0.7 * vmem_cap)
    cos_itemsize = jnp.dtype(cos_dtype).itemsize
    tb, tc, fp = _choose_tiles(B, C, D, tile_b, tile_c, cos_itemsize, budget)
    vmem_limit = int(min(0.9 * vmem_cap, max(fp + (8 << 20), 32 << 20)))

    Bp = _round_up(B, tb)
    Cp = _round_up(C, tc)
    if Bp != B:
        # Padded rows get label 0; they are sliced off below, so the stray
        # one_hot hit on column 0 of padded rows is harmless.
        xn = jnp.pad(xn, ((0, Bp - B), (0, 0)))
        lab = jnp.pad(lab, ((0, Bp - B), (0, 0)))
    if Cp != C:
        wf = jnp.pad(wf, ((0, Cp - C), (0, 0)))
        inv_wn = jnp.pad(inv_wn, ((0, 0), (0, Cp - C)))    # zero norm -> cosine 0

    # Class tiles OUTER (slow), batch tiles INNER (fast): weight tile is read
    # from HBM exactly once and stays resident across the inner batch loop.
    grid = (Cp // tc, Bp // tb)
    kernel = _make_arcface_kernel(scale, margin, tc, use_bf16_matmul)

    out, cos = pl.pallas_call(
        kernel,
        out_shape=(
            jax.ShapeDtypeStruct((Bp, Cp), jnp.float32),
            jax.ShapeDtypeStruct((Bp, Cp), cos_dtype),
        ),
        grid_spec=pltpu.PrefetchScalarGridSpec(
            num_scalar_prefetch=0,
            grid=grid,
            in_specs=[
                pl.BlockSpec((tb, D), lambda j, i: (i, 0)),   # x_norm tile (streams)
                pl.BlockSpec((tc, D), lambda j, i: (j, 0)),   # weight tile (resident)
                pl.BlockSpec((1, tc), lambda j, i: (0, j)),   # 1/||w|| row
                pl.BlockSpec((tb, 1), lambda j, i: (i, 0)),   # labels tile
            ],
            out_specs=[
                pl.BlockSpec((tb, tc), lambda j, i: (i, j)),
                pl.BlockSpec((tb, tc), lambda j, i: (i, j)),
            ],
        ),
        compiler_params=pltpu.CompilerParams(
            dimension_semantics=("parallel", "parallel"),
            vmem_limit_bytes=vmem_limit,
        ),
    )(xn, wf, inv_wn, lab)

    if Bp != B or Cp != C:
        out = out[:B, :C]
        cos = cos[:B, :C]
    return out, cos


def _reference(x, weight, label, scale=30.0, margin=0.5):
    cos_m, sin_m = math.cos(margin), math.sin(margin)
    threshold = math.cos(math.pi - margin)
    mm = math.sin(math.pi - margin) * margin
    xn = x / jnp.maximum(jnp.linalg.norm(x, axis=1, keepdims=True), 1e-12)
    wn = weight / jnp.maximum(jnp.linalg.norm(weight, axis=1, keepdims=True), 1e-12)
    cosine = xn @ wn.T
    sine = jnp.sqrt(1.0 - cosine ** 2)
    phi = cosine * cos_m - sine * sin_m
    phi = jnp.where(cosine > threshold, phi, cosine - mm)
    one_hot = jax.nn.one_hot(label, weight.shape[0], dtype=cosine.dtype)
    output = (one_hot * phi + (1.0 - one_hot) * cosine) * scale
    return output, cosine * scale


def _rand_problem(key, B, C, D):
    kx, kw, kl = jax.random.split(key, 3)
    x = jax.random.normal(kx, (B, D), dtype=jnp.float32)
    bound = math.sqrt(6.0 / (D + C))
    w = jax.random.uniform(kw, (C, D), minval=-bound, maxval=bound,
                           dtype=jnp.float32)
    lbl = jax.random.randint(kl, (B,), 0, C, dtype=jnp.int32)
    return x, w, lbl


if __name__ == "__main__":
    scale, margin = 30.0, 0.5
    k1, k2, k3 = jax.random.split(jax.random.PRNGKey(0), 3)

    # --- Test 1: small shapes, single-tile path (grid = (1,1)), exact f32 ----
    B, Din, Cout = 8, 32, 16
    x, w, lbl = _rand_problem(k1, B, Cout, Din)
    out, cos = arcface_forward(x, w, lbl, scale=scale, margin=margin,
                               cos_dtype=jnp.float32)
    jax.block_until_ready((out, cos))
    ref_out, ref_cos = _reference(x, w, lbl, scale=scale, margin=margin)
    assert out.shape == (B, Cout) and cos.shape == (B, Cout)
    assert jnp.allclose(out, ref_out, atol=1e-4, rtol=1e-4)
    assert jnp.allclose(cos, ref_cos, atol=1e-4, rtol=1e-4)

    # --- Test 2: real grid (class-outer/batch-inner), class padding, f32 -----
    B2, C2, D2 = 16, 300, 32
    x2, w2, l2 = _rand_problem(k2, B2, C2, D2)
    out2, cos2 = arcface_forward(x2, w2, l2, scale=scale, margin=margin,
                                 tile_b=8, tile_c=128, cos_dtype=jnp.float32)
    jax.block_until_ready((out2, cos2))
    ref_out2, ref_cos2 = _reference(x2, w2, l2, scale=scale, margin=margin)
    assert out2.shape == (B2, C2) and cos2.shape == (B2, C2)
    assert jnp.allclose(out2, ref_out2, atol=1e-4, rtol=1e-4)
    assert jnp.allclose(cos2, ref_cos2, atol=1e-4, rtol=1e-4)

    # --- Test 3: bf16 MXU path + bf16 cosine output (reduced writeback) ------
    B3, C3, D3 = 64, 512, 64
    x3, w3, l3 = _rand_problem(k3, B3, C3, D3)
    out3, cos3 = arcface_forward(x3, w3, l3, scale=scale, margin=margin,
                                 tile_b=32, tile_c=128,
                                 cos_dtype=jnp.bfloat16, use_bf16_matmul=True)
    jax.block_until_ready((out3, cos3))
    ref_out3, ref_cos3 = _reference(x3, w3, l3, scale=scale, margin=margin)
    assert out3.shape == (B3, C3) and cos3.shape == (B3, C3)
    assert jnp.allclose(out3, ref_out3, atol=4e-1, rtol=2e-2)
    assert jnp.allclose(cos3.astype(jnp.float32), ref_cos3, atol=4e-1, rtol=2e-2)

    print("KERNEL_OK")
</pallas_src>

<mosaic_0001>
module attributes {stable_mosaic.version = 11 : i64} {
  func.func @arcface_kernel(%arg0: i32, %arg1: i32, %arg2: memref<8x32xf32, #tpu.memory_space<vmem>>, %arg3: memref<16x32xf32, #tpu.memory_space<vmem>>, %arg4: memref<1x16xf32, #tpu.memory_space<vmem>>, %arg5: memref<8x1xi32, #tpu.memory_space<vmem>>, %arg6: memref<8x16xf32, #tpu.memory_space<vmem>>, %arg7: memref<8x16xf32, #tpu.memory_space<vmem>>) attributes {dimension_semantics = [#tpu.dimension_semantics<parallel>, #tpu.dimension_semantics<parallel>], iteration_bounds = array<i64: 1, 1>, scalar_prefetch = 0 : i64, scratch_operands = 0 : i64, tpu.core_type = #tpu.core_type<tc>, window_params = [{transform_indices = @transform_0, window_bounds = array<i64: 8, 32>}, {transform_indices = @transform_1, window_bounds = array<i64: 16, 32>}, {transform_indices = @transform_2, window_bounds = array<i64: 1, 16>}, {transform_indices = @transform_3, window_bounds = array<i64: 8, 1>}, {transform_indices = @transform_4, window_bounds = array<i64: 8, 16>}, {transform_indices = @transform_5, window_bounds = array<i64: 8, 16>}]} {
    %c0 = arith.constant 0 : index
    %c0_0 = arith.constant 0 : index
    %0 = vector.load %arg2[%c0, %c0_0] : memref<8x32xf32, #tpu.memory_space<vmem>>, vector<8x32xf32>
    %c0_1 = arith.constant 0 : index
    %c0_2 = arith.constant 0 : index
    %1 = vector.load %arg3[%c0_1, %c0_2] : memref<16x32xf32, #tpu.memory_space<vmem>>, vector<16x32xf32>
    %c0_3 = arith.constant 0 : index
    %c0_4 = arith.constant 0 : index
    %2 = vector.load %arg4[%c0_3, %c0_4] : memref<1x16xf32, #tpu.memory_space<vmem>>, vector<1x16xf32>
    %c0_5 = arith.constant 0 : index
    %c0_6 = arith.constant 0 : index
    %3 = vector.load %arg5[%c0_5, %c0_6] : memref<8x1xi32, #tpu.memory_space<vmem>>, vector<8x1xi32>
    %cst = arith.constant dense<0.000000e+00> : vector<8x16xf32>
    %4 = tpu.matmul %0, %1, %cst {dimension_numbers = #tpu.dot_dimension_numbers<[1], [1], [0], [0], [0, 0, 1, 0], [], []>} : vector<8x32xf32>, vector<16x32xf32>, vector<8x16xf32> -> vector<8x16xf32>
    %5 = vector.broadcast %2 : vector<1x16xf32> to vector<8x16xf32>
    %6 = arith.mulf %4, %5 : vector<8x16xf32>
    %7 = arith.mulf %6, %6 : vector<8x16xf32>
    %cst_7 = arith.constant 1.000000e+00 : f32
    %8 = vector.broadcast %cst_7 : f32 to vector<8x16xf32>
    %9 = arith.subf %8, %7 : vector<8x16xf32>
    %cst_8 = arith.constant 0.000000e+00 : f32
    %10 = vector.broadcast %cst_8 : f32 to vector<8x16xf32>
    %11 = arith.maximumf %9, %10 : vector<8x16xf32>
    %12 = math.sqrt %11 : vector<8x16xf32>
    %cst_9 = arith.constant 0.87758255 : f32
    %13 = vector.broadcast %cst_9 : f32 to vector<8x16xf32>
    %14 = arith.mulf %6, %13 : vector<8x16xf32>
    %cst_10 = arith.constant 0.47942555 : f32
    %15 = vector.broadcast %cst_10 : f32 to vector<8x16xf32>
    %16 = arith.mulf %12, %15 : vector<8x16xf32>
    %17 = arith.subf %14, %16 : vector<8x16xf32>
    %cst_11 = arith.constant -0.87758255 : f32
    %18 = vector.broadcast %cst_11 : f32 to vector<8x16xf32>
    %19 = arith.cmpf ogt, %6, %18 : vector<8x16xf32>
    %cst_12 = arith.constant 0.239712775 : f32
    %20 = vector.broadcast %cst_12 : f32 to vector<8x16xf32>
    %21 = arith.subf %6, %20 : vector<8x16xf32>
    %22 = arith.select %19, %17, %21 : vector<8x16xi1>, vector<8x16xf32>
    %c16_i32 = arith.constant 16 : i32
    %23 = arith.muli %arg0, %c16_i32 : i32
    %24 = vector.broadcast %23 : i32 to vector<8x1xi32>
    %25 = arith.subi %3, %24 : vector<8x1xi32>
    %26 = tpu.iota {dimensions = array<i32: 1>} : vector<8x16xi32>
    %27 = vector.broadcast %25 : vector<8x1xi32> to vector<8x16xi32>
    %28 = arith.cmpi eq, %26, %27 : vector<8x16xi32>
    %cst_13 = arith.constant 3.000000e+01 : f32
    %29 = vector.broadcast %cst_13 : f32 to vector<8x16xf32>
    %30 = arith.mulf %6, %29 : vector<8x16xf32>
    %cst_14 = arith.constant 3.000000e+01 : f32
    %31 = vector.broadcast %cst_14 : f32 to vector<8x16xf32>
    %32 = arith.mulf %22, %31 : vector<8x16xf32>
    %33 = arith.select %28, %32, %30 : vector<8x16xi1>, vector<8x16xf32>
    %c0_15 = arith.constant 0 : index
    %c0_16 = arith.constant 0 : index
    %34 = vector.load %arg6[%c0_15, %c0_16] : memref<8x16xf32, #tpu.memory_space<vmem>>, vector<8x16xf32>
    tpu.vector_store %arg6[%c0_15, %c0_16], %33 {strides = array<i32>} : memref<8x16xf32, #tpu.memory_space<vmem>>, vector<8x16xf32>,
    %c0_17 = arith.constant 0 : index
    %c0_18 = arith.constant 0 : index
    %35 = vector.load %arg7[%c0_17, %c0_18] : memref<8x16xf32, #tpu.memory_space<vmem>>, vector<8x16xf32>
    tpu.vector_store %arg7[%c0_17, %c0_18], %30 {strides = array<i32>} : memref<8x16xf32, #tpu.memory_space<vmem>>, vector<8x16xf32>,
    return
  }
  func.func @transform_0(%arg0: i32, %arg1: i32) -> (i32, i32) {
    %c0_i32 = arith.constant 0 : i32
    %c0_i32_0 = arith.constant 0 : i32
    return %arg1, %c0_i32 : i32, i32
  }
  func.func @transform_1(%arg0: i32, %arg1: i32) -> (i32, i32) {
    %c0_i32 = arith.constant 0 : i32
    %c0_i32_0 = arith.constant 0 : i32
    return %arg0, %c0_i32 : i32, i32
  }
  func.func @transform_2(%arg0: i32, %arg1: i32) -> (i32, i32) {
    %c0_i32 = arith.constant 0 : i32
    %c0_i32_0 = arith.constant 0 : i32
    return %c0_i32, %arg0 : i32, i32
  }
  func.func @transform_3(%arg0: i32, %arg1: i32) -> (i32, i32) {
    %c0_i32 = arith.constant 0 : i32
    %c0_i32_0 = arith.constant 0 : i32
    return %arg1, %c0_i32 : i32, i32
  }
  func.func @transform_4(%arg0: i32, %arg1: i32) -> (i32, i32) {
    %c0_i32 = arith.constant 0 : i32
    return %arg1, %arg0 : i32, i32
  }
  func.func @transform_5(%arg0: i32, %arg1: i32) -> (i32, i32) {
    %c0_i32 = arith.constant 0 : i32
    return %arg1, %arg0 : i32, i32
  }
}

</mosaic_0001>

<bundles_post_ra>
// kernel: tpu_custom_call.1
= control target key start
LH: loop header
LB: loop body
LE: loop exit
PB: predicated region body
PF: predicated region fallthrough
CT: control target
= control target key end

     0   :  { %11 = vsyncpa [#allocation3], 0  ;;  %s337_s0 = inlined_call_operand.vmem [shape: f32[8,32], index: 0, kind: input, shape index: {}]   ;;  %s338_s1 = inlined_call_operand.hbm [shape: f32[16,32], index: 1, kind: input, shape index: {}]   ;;  %s339_s2 = inlined_call_operand.vmem [shape: f32[1,16], index: 2, kind: input, shape index: {}]   ;;  %s340_s3 = inlined_call_operand.vmem [shape: s32[8,1], index: 3, kind: input, shape index: {}]   ;;  %s341_s4 = inlined_call_operand.hbm [shape: f32[8,16], index: 4, kind: output, shape index: {0}]   ;;  %s342_s5 = inlined_call_operand.hbm [shape: f32[8,16], index: 5, kind: output, shape index: {1}]  }
   0x1   :  { %12 = vsyncpa [#allocation4], 0 }
   0x2   :  { %13 = vsyncpa [#allocation7], 0  ;;  %s279_s18 = smov [#allocation2]  }
   0x3   :  { %s21_s19 = sshll.u32 %s279_s18, 4  ;;  %s22_s19 = int_to_ptr.vmem [resolvable:$true] %s21_s19 }
   0x4   :  { %s221_s20 = scalar_lea.vmem %s22_s19, 256  ;;  %p226_p1 = scmp.lt.s32.totalorder %s22_s19, %s22_s19 }
   0x5   :  { %p222_p0 = scmp.ne.s32.totalorder %s22_s19, %s221_s20  ;;  %p227_p2 = scmp.lt.s32.totalorder %s221_s20, %s221_s20 }
   0x7   :  { %p228_p3 = por %p227_p2, %p226_p1 }
   0x9   :  { %p229_p4 = pnand %p228_p3, %p222_p0 }
   0xb   :  { %232 = shalt.err (!%p229_p4)
}
   0xc   :  { %s280_s21 = smov 128   ;;  %s281_s22 = smov 8  }
   0xd   :  { %27 = dma.hbm_to_vmem [thread:$0]  %s338_s1, 256, %s22_s19, [#allocation3], %s280_s21, %s280_s21, %s281_s22  }
   0xe   :  { %273 = dma.done.wait [#allocation3], 256  }
   0xf   :  { %274 = vsyncadd [#allocation3], 4294967040  ;;  %v282_v0 = vmov 0.0   ;;  %vm283_vm0 = vmmov 0   ;;  %v284_v1 = vmov 0   ;;  %vm40_vm1 = vcmask 261120  }
  0x10   :  { %195 = vmatprep.subr.mxu0 %v282_v0  ;;  %199 = vmatprep.mubr.msk.f32.mxu0 %vm283_vm0, %v282_v0  ;;  %v37_v2 = vld [vmem:[#allocation2 + $0x8] sm:$0xff]  ;;  %v39_v3 = vld [vmem:[%s340_s3] sm:$0xff]  ;;  %s285_s30 = smov [#allocation6]   ;;  %vm155_vm2 = vcmask 130048  }
  0x11   :  { %210 = vset.pattern.permute.xlu0 %v284_v1  ;;  %196 = vmatpush3.xpose.msk.msra.mxu0 %vm40_vm1, %v37_v2  ;;  %v36_v4 = vld [vmem:[#allocation2] sm:$0xff]  ;;  %s174_s6 = sshll.u32 %s285_s30, 4  ;;  %s175_s6 = int_to_ptr.vmem [resolvable:$true] %s174_s6 }
  0x12   :  { %197 = vmatprep.subr.mxu0 %v282_v0  ;;  %149 = vperm.xlu0 %210, %v39_v3   ;;  %v35_v5 = vld [vmem:[%s337_s0] sm:$0xff]  ;;  %s233_s3 = scalar_lea.vmem %s175_s6, 128  ;;  %p238_p6 = scmp.lt.s32.totalorder %s175_s6, %s175_s6 }
  0x13   :  { %v190_v6 = vld [vmem:[%s339_s2] ss:$0 sm:$0xff]  ;;  %p234_p5 = scmp.ne.s32.totalorder %s175_s6, %s233_s3  ;;  %p239_p7 = scmp.lt.s32.totalorder %s233_s3, %s233_s3 }
  0x15   :  { %198 = vmatpush3.xpose.msk.msra.mxu0 %vm40_vm1, %v36_v4  ;;  %p240_p8 = por %p239_p7, %p238_p6 }
  0x17   :  { %p241_p9 = pnand %p240_p8, %p234_p5 }
  0x18   :  { %200 = vmatmul.mubr.msk.f32.vlgmr.msra.gmra.mxu0 %vm40_vm1, %v35_v5 }
  0xd8   :  { %v116_v7 = vpop.f32.mrf.mxu0 }
  0xd9   :  { %v126_v8 = vmul.f32 %v190_v6, %v116_v7 }
  0xda   :  { %v201_v9 = vpop.f32.mrf.mxu0 }
  0xdb   :  { %v127_v10 = vmul.f32 %v126_v8, %v126_v8  ;;  %v152_v11 = vmul.f32 30.0, %v126_v8 }
  0xdd   :  { %v128_v12 = vsub.f32 1.0, %v127_v10  ;;  %157 = vst.msk [vmem:[#allocation6] sm:$0xff] %vm155_vm2, %v152_v11 }
  0xdf   :  { %v129_v13 = vmax.f32 %v128_v12, 0.0 }
  0xe0   :  { %244 = shalt.err (!%p241_p9)
}
  0xe1   :  { %177 = dma.vmem_to_hbm [thread:$0]  %s175_s6, 128, %s342_s5, [#allocation7]   ;;  %211 = vrsqrt.f32 %v129_v13  ;;  %v146_v15 = vlaneseq  ;;  %vm132_vm3 = vcmp.eq.f32.partialorder %v129_v13, inf  ;;  %v135_v17 = vand.u32 2147483648, %v129_v13  ;;  %v150_v23 = vpop.permute.xlu0 %149 }
  0xe2   :  { %vm134_vm4 = vcmp.eq.f32.partialorder %v129_v13, 0.0  ;;  %v137_v20 = vmul.f32 0.87758255, %v126_v8  ;;  %v191_v25 = vadd.f32 -0.23971277, %v126_v8  ;;  %s286_s7 = smov [#allocation5]  }
  0xe3   :  { %v147_v21 = vand.u32 127, %v146_v15  ;;  %vm140_vm5 = vcmp.gt.f32.partialorder %v126_v8, -0.87758255  ;;  %s164_s8 = sshll.u32 %s286_s7, 4  ;;  %s165_s8 = int_to_ptr.vmem [resolvable:$true] %s164_s8 }
  0xe4   :  { %s253_s5 = scalar_lea.vmem %s165_s8, 128  ;;  %p258_p11 = scmp.lt.s32.totalorder %s165_s8, %s165_s8 }
  0xe5   :  { %vm151_vm6 = vcmp.eq.s32.totalorder %v147_v21, %v150_v23  ;;  %p254_p10 = scmp.ne.s32.totalorder %s165_s8, %s253_s5  ;;  %p259_p12 = scmp.lt.s32.totalorder %s253_s5, %s253_s5 }
  0xe7   :  { %p260_p13 = por %p259_p12, %p258_p11 }
  0xe9   :  { %p261_p0 = pnand %p260_p13, %p254_p10 }
  0xee   :  { %v212_v14 = vpop.eup %211 }
  0xef   :  { %v131_v16 = vmul.f32 %v212_v14, %v129_v13 }
  0xf1   :  { %v133_v18 = vsel %vm132_vm3, %v129_v13, %v131_v16 }
  0xf2   :  { %v136_v19 = vsel %vm134_vm4, %v135_v17, %v133_v18 }
  0xf3   :  { %v138_v22 = vmul.f32 0.47942555, %v136_v19 }
  0xf5   :  { %v139_v24 = vsub.f32 %v137_v20, %v138_v22 }
  0xf7   :  { %v142_v26 = vsel %vm140_vm5, %v139_v24, %v191_v25 }
  0xf8   :  { %v153_v27 = vmul.f32 30.0, %v142_v26 }
  0xfa   :  { %v154_v28 = vsel %vm151_vm6, %v153_v27, %v152_v11 }
  0xfb   :  { %156 = vst.msk [vmem:[#allocation5] sm:$0xff] %vm155_vm2, %v154_v28 }
  0xfc   :  { %264 = shalt.err (!%p261_p0)
}
  0xfd   :  { %167 = dma.vmem_to_hbm [thread:$0]  %s165_s8, 128, %s341_s4, [#allocation4]  }
  0xfe   :  { %275 = dma.done.wait [#allocation4], 128  }
  0xff   :  { %276 = vsyncadd [#allocation4], 4294967168 }
 0x100   :  { %277 = dma.done.wait [#allocation7], 128  }
 0x101   :  { %278 = vsyncadd [#allocation7], 4294967168 }
 0x102   :  { %184 = vsyncpa [#allocation3], 1 }
 0x103   :  { %185 = vsyncpa [#allocation4], 1 }
 0x104   :  { %186 = vsyncpa [#allocation7], 1 }

</bundles_post_ra>
